<compile_context>
chip_gen: v7x
topology: tpu7x:2x2x1
jax: 0.10.0
libtpu: 0.0.40
codegen_flags: <defaults>
</compile_context>

<pallas_src>
import functools

import jax
import jax.numpy as jnp
from jax.experimental import pallas as pl
from jax.experimental.pallas import tpu as pltpu

MIN_VALUE = 0.0
MAX_VALUE = 0.5

_LANE = 128
_SUB = 8


def _round_up(a, b):
    return (a + b - 1) // b * b


def _convt1x1_clamp_kernel(w_ref, b_ref, x_ref, o_ref, *, nb, cin, cout,
                           min_value, max_value):
    # w_ref: SMEM (cin, cout) f32      b_ref: SMEM (1, cout) f32
    # x_ref: VMEM (nb, cin, RT, 128)   o_ref: VMEM (nb, cout, RT, 128)
    # Hoist the tiny scalar weight/bias reads out of all loops.
    wv = [[w_ref[ci, co] for co in range(cout)] for ci in range(cin)]
    bv = [b_ref[0, co] for co in range(cout)]
    for b in range(nb):
        # One dense (RT,128) load per input channel, reused for every output
        # channel (no per-co re-extraction / reload).
        planes = [x_ref[b, ci].astype(jnp.float32) for ci in range(cin)]
        for co in range(cout):
            y = planes[0] * wv[0][co]
            for ci in range(1, cin):
                y = y + planes[ci] * wv[ci][co]
            y = y + bv[co]
            y = jnp.maximum(y, min_value)        # torch.clamp_min
            y = jnp.minimum(y, max_value)        # torch.clamp_max
            o_ref[b, co] = y.astype(o_ref.dtype)  # dense (8,128)-aligned store


def conv_transpose1x1_clamp(x_nchw, weight, bias, *,
                            min_value=MIN_VALUE, max_value=MAX_VALUE,
                            block_pair_bytes=4 * 1024 * 1024):
    """x_nchw: (N, C_in, H, W); weight: (C_in, C_out, 1, 1); bias: (C_out,)."""
    n, cin, h, w = x_nchw.shape
    w_cin, cout, kh, kw = weight.shape
    # The "1x1 convT == per-pixel channel mix" identity only holds here:
    assert (kh, kw) == (1, 1) and w_cin == cin, \
        "only ConvTranspose2d(kernel=1, stride=1, padding=0, groups=1) supported"

    hw = h * w
    hw_pad = _round_up(hw, _LANE)
    rows = hw_pad // _LANE

    # Free view to (N, C, rows, 128); pad HW up to a lane multiple if needed so
    # every channel plane is a dense lane-aligned slab (no unguarded full-HW
    # fallback blocks).
    x3 = x_nchw.reshape(n, cin, hw)
    if hw_pad != hw:
        x3 = jnp.pad(x3, ((0, 0), (0, 0), (0, hw_pad - hw)))
    x4 = x3.reshape(n, cin, rows, _LANE)

    itemsize = jnp.dtype(x_nchw.dtype).itemsize
    rows_budget = max(1, block_pair_bytes // ((cin + cout) * _LANE * itemsize))

    if rows >= 2 * _SUB:
        # Large spatial extent: tile the row axis, one image per block.
        nb = 1
        rt = min(rows, rows_budget)
        if n == 1:
            # Guarantee >= 2 spatial tiles so both v7x TensorCores get work.
            rt = min(rt, _round_up(pl.cdiv(rows, 2), _SUB))
        rt = max(_SUB, (rt // _SUB) * _SUB)   # (8,128)-divisible block rows
        if rt >= rows:
            rt = rows                         # full-dim block is also legal
    else:
        # Small spatial extent: take all rows and amortize the ~0.35us
        # per-grid-step pipeline overhead over several batch images.
        rt = rows
        nb_budget = max(1, rows_budget // max(1, rows))
        nb_parallel = max(1, n // 2) if n > 1 else 1
        nb = max(1, min(n, nb_budget, nb_parallel))

    grid = (pl.cdiv(n, nb), pl.cdiv(rows, rt))

    w_mat = weight.reshape(cin, cout).astype(jnp.float32)   # == weight[:, :, 0, 0]
    b_mat = bias.reshape(1, cout).astype(jnp.float32)

    kernel = functools.partial(
        _convt1x1_clamp_kernel, nb=nb, cin=cin, cout=cout,
        min_value=float(min_value), max_value=float(max_value))

    out4 = pl.pallas_call(
        kernel,
        out_shape=jax.ShapeDtypeStruct((n, cout, rows, _LANE), x_nchw.dtype),
        grid=grid,
        in_specs=[
            pl.BlockSpec(memory_space=pltpu.MemorySpace.SMEM),   # weight (scalars)
            pl.BlockSpec(memory_space=pltpu.MemorySpace.SMEM),   # bias
            pl.BlockSpec((nb, cin, rt, _LANE), lambda bi, si: (bi, 0, si, 0)),
        ],
        out_specs=pl.BlockSpec((nb, cout, rt, _LANE),
                               lambda bi, si: (bi, 0, si, 0)),
        compiler_params=pltpu.CompilerParams(
            dimension_semantics=("parallel", "parallel"),
            vmem_limit_bytes=32 * 1024 * 1024),
    )(w_mat, b_mat, x4)

    out3 = out4.reshape(n, cout, hw_pad)
    if hw_pad != hw:
        out3 = out3[:, :, :hw]
    return out3.reshape(n, cout, h, w)


def reference(x_nchw, weight, bias, min_value=MIN_VALUE, max_value=MAX_VALUE):
    # Pure-JAX reference of ConvTranspose2d(1x1, stride=1, pad=0) + clamps.
    y = jnp.einsum("nchw,cd->ndhw", x_nchw, weight[:, :, 0, 0])
    y = y + bias[None, :, None, None]
    y = jnp.maximum(y, min_value)
    return jnp.minimum(y, max_value)


if __name__ == "__main__":
    key = jax.random.PRNGKey(0)
    kx, kw_, kb = jax.random.split(key, 3)

    # Small shapes consistent with the module (N, C=4, H, W).
    N, C, H, W = 2, 4, 16, 16
    x = jax.random.normal(kx, (N, C, H, W), dtype=jnp.float32)

    # ConvTranspose2d(4, 4, 1): weight (in=4, out=4, 1, 1), bias (4,)
    weight = jax.random.normal(kw_, (C, C, 1, 1), dtype=jnp.float32) * 0.5
    bias = jax.random.normal(kb, (C,), dtype=jnp.float32) * 0.1

    out = conv_transpose1x1_clamp(x, weight, bias)
    out = jax.block_until_ready(out)
    ref = reference(x, weight, bias)
    assert out.shape == (N, C, H, W)
    assert jnp.allclose(out, ref, atol=1e-5, rtol=1e-5)

    # Also exercise the HW-padding path (H*W not a multiple of 128), like the
    # module's real 124x124 input.
    x2 = jax.random.normal(kx, (1, C, 12, 12), dtype=jnp.float32)
    out2 = jax.block_until_ready(conv_transpose1x1_clamp(x2, weight, bias))
    ref2 = reference(x2, weight, bias)
    assert out2.shape == (1, C, 12, 12)
    assert jnp.allclose(out2, ref2, atol=1e-5, rtol=1e-5)

    print("KERNEL_OK")
</pallas_src>

<mosaic_0001>
module attributes {stable_mosaic.version = 11 : i64} {
  func.func @_convt1x1_clamp_kernel(%arg0: i32, %arg1: i32, %arg2: memref<4x4xf32, #tpu.memory_space<smem>>, %arg3: memref<1x4xf32, #tpu.memory_space<smem>>, %arg4: memref<1x4x2x128xf32, #tpu.memory_space<vmem>>, %arg5: memref<1x4x2x128xf32, #tpu.memory_space<vmem>>) attributes {dimension_semantics = [#tpu.dimension_semantics<parallel>, #tpu.dimension_semantics<parallel>], iteration_bounds = array<i64: 2, 1>, scalar_prefetch = 0 : i64, scratch_operands = 0 : i64, tpu.core_type = #tpu.core_type<tc>, window_params = [{transform_indices = @transform_0, window_bounds = array<i64: 4, 4>}, {transform_indices = @transform_1, window_bounds = array<i64: 1, 4>}, {transform_indices = @transform_2, window_bounds = array<i64: 1, 4, 2, 128>}, {transform_indices = @transform_3, window_bounds = array<i64: 1, 4, 2, 128>}]} {
    %c0 = arith.constant 0 : index
    %c0_0 = arith.constant 0 : index
    %0 = memref.load %arg2[%c0, %c0_0] : memref<4x4xf32, #tpu.memory_space<smem>>
    %c0_1 = arith.constant 0 : index
    %c1 = arith.constant 1 : index
    %1 = memref.load %arg2[%c0_1, %c1] : memref<4x4xf32, #tpu.memory_space<smem>>
    %c0_2 = arith.constant 0 : index
    %c2 = arith.constant 2 : index
    %2 = memref.load %arg2[%c0_2, %c2] : memref<4x4xf32, #tpu.memory_space<smem>>
    %c0_3 = arith.constant 0 : index
    %c3 = arith.constant 3 : index
    %3 = memref.load %arg2[%c0_3, %c3] : memref<4x4xf32, #tpu.memory_space<smem>>
    %c1_4 = arith.constant 1 : index
    %c0_5 = arith.constant 0 : index
    %4 = memref.load %arg2[%c1_4, %c0_5] : memref<4x4xf32, #tpu.memory_space<smem>>
    %c1_6 = arith.constant 1 : index
    %c1_7 = arith.constant 1 : index
    %5 = memref.load %arg2[%c1_6, %c1_7] : memref<4x4xf32, #tpu.memory_space<smem>>
    %c1_8 = arith.constant 1 : index
    %c2_9 = arith.constant 2 : index
    %6 = memref.load %arg2[%c1_8, %c2_9] : memref<4x4xf32, #tpu.memory_space<smem>>
    %c1_10 = arith.constant 1 : index
    %c3_11 = arith.constant 3 : index
    %7 = memref.load %arg2[%c1_10, %c3_11] : memref<4x4xf32, #tpu.memory_space<smem>>
    %c2_12 = arith.constant 2 : index
    %c0_13 = arith.constant 0 : index
    %8 = memref.load %arg2[%c2_12, %c0_13] : memref<4x4xf32, #tpu.memory_space<smem>>
    %c2_14 = arith.constant 2 : index
    %c1_15 = arith.constant 1 : index
    %9 = memref.load %arg2[%c2_14, %c1_15] : memref<4x4xf32, #tpu.memory_space<smem>>
    %c2_16 = arith.constant 2 : index
    %c2_17 = arith.constant 2 : index
    %10 = memref.load %arg2[%c2_16, %c2_17] : memref<4x4xf32, #tpu.memory_space<smem>>
    %c2_18 = arith.constant 2 : index
    %c3_19 = arith.constant 3 : index
    %11 = memref.load %arg2[%c2_18, %c3_19] : memref<4x4xf32, #tpu.memory_space<smem>>
    %c3_20 = arith.constant 3 : index
    %c0_21 = arith.constant 0 : index
    %12 = memref.load %arg2[%c3_20, %c0_21] : memref<4x4xf32, #tpu.memory_space<smem>>
    %c3_22 = arith.constant 3 : index
    %c1_23 = arith.constant 1 : index
    %13 = memref.load %arg2[%c3_22, %c1_23] : memref<4x4xf32, #tpu.memory_space<smem>>
    %c3_24 = arith.constant 3 : index
    %c2_25 = arith.constant 2 : index
    %14 = memref.load %arg2[%c3_24, %c2_25] : memref<4x4xf32, #tpu.memory_space<smem>>
    %c3_26 = arith.constant 3 : index
    %c3_27 = arith.constant 3 : index
    %15 = memref.load %arg2[%c3_26, %c3_27] : memref<4x4xf32, #tpu.memory_space<smem>>
    %c0_28 = arith.constant 0 : index
    %c0_29 = arith.constant 0 : index
    %16 = memref.load %arg3[%c0_28, %c0_29] : memref<1x4xf32, #tpu.memory_space<smem>>
    %c0_30 = arith.constant 0 : index
    %c1_31 = arith.constant 1 : index
    %17 = memref.load %arg3[%c0_30, %c1_31] : memref<1x4xf32, #tpu.memory_space<smem>>
    %c0_32 = arith.constant 0 : index
    %c2_33 = arith.constant 2 : index
    %18 = memref.load %arg3[%c0_32, %c2_33] : memref<1x4xf32, #tpu.memory_space<smem>>
    %c0_34 = arith.constant 0 : index
    %c3_35 = arith.constant 3 : index
    %19 = memref.load %arg3[%c0_34, %c3_35] : memref<1x4xf32, #tpu.memory_space<smem>>
    %c0_36 = arith.constant 0 : index
    %c0_37 = arith.constant 0 : index
    %c0_38 = arith.constant 0 : index
    %c0_39 = arith.constant 0 : index
    %20 = vector.load %arg4[%c0_36, %c0_37, %c0_38, %c0_39] : memref<1x4x2x128xf32, #tpu.memory_space<vmem>>, vector<1x1x2x128xf32>
    %21 = vector.shape_cast %20 : vector<1x1x2x128xf32> to vector<2x128xf32>
    %c0_40 = arith.constant 0 : index
    %c1_41 = arith.constant 1 : index
    %c0_42 = arith.constant 0 : index
    %c0_43 = arith.constant 0 : index
    %22 = vector.load %arg4[%c0_40, %c1_41, %c0_42, %c0_43] : memref<1x4x2x128xf32, #tpu.memory_space<vmem>>, vector<1x1x2x128xf32>
    %23 = vector.shape_cast %22 : vector<1x1x2x128xf32> to vector<2x128xf32>
    %c0_44 = arith.constant 0 : index
    %c2_45 = arith.constant 2 : index
    %c0_46 = arith.constant 0 : index
    %c0_47 = arith.constant 0 : index
    %24 = vector.load %arg4[%c0_44, %c2_45, %c0_46, %c0_47] : memref<1x4x2x128xf32, #tpu.memory_space<vmem>>, vector<1x1x2x128xf32>
    %25 = vector.shape_cast %24 : vector<1x1x2x128xf32> to vector<2x128xf32>
    %c0_48 = arith.constant 0 : index
    %c3_49 = arith.constant 3 : index
    %c0_50 = arith.constant 0 : index
    %c0_51 = arith.constant 0 : index
    %26 = vector.load %arg4[%c0_48, %c3_49, %c0_50, %c0_51] : memref<1x4x2x128xf32, #tpu.memory_space<vmem>>, vector<1x1x2x128xf32>
    %27 = vector.shape_cast %26 : vector<1x1x2x128xf32> to vector<2x128xf32>
    %28 = vector.broadcast %0 : f32 to vector<2x128xf32>
    %29 = arith.mulf %21, %28 : vector<2x128xf32>
    %30 = vector.broadcast %4 : f32 to vector<2x128xf32>
    %31 = arith.mulf %23, %30 : vector<2x128xf32>
    %32 = arith.addf %29, %31 : vector<2x128xf32>
    %33 = vector.broadcast %8 : f32 to vector<2x128xf32>
    %34 = arith.mulf %25, %33 : vector<2x128xf32>
    %35 = arith.addf %32, %34 : vector<2x128xf32>
    %36 = vector.broadcast %12 : f32 to vector<2x128xf32>
    %37 = arith.mulf %27, %36 : vector<2x128xf32>
    %38 = arith.addf %35, %37 : vector<2x128xf32>
    %39 = vector.broadcast %16 : f32 to vector<2x128xf32>
    %40 = arith.addf %38, %39 : vector<2x128xf32>
    %cst = arith.constant 0.000000e+00 : f32
    %41 = vector.broadcast %cst : f32 to vector<2x128xf32>
    %42 = arith.maximumf %40, %41 : vector<2x128xf32>
    %cst_52 = arith.constant 5.000000e-01 : f32
    %43 = vector.broadcast %cst_52 : f32 to vector<2x128xf32>
    %44 = arith.minimumf %42, %43 : vector<2x128xf32>
    %c0_53 = arith.constant 0 : index
    %c0_54 = arith.constant 0 : index
    %c0_55 = arith.constant 0 : index
    %c0_56 = arith.constant 0 : index
    %45 = vector.load %arg5[%c0_53, %c0_54, %c0_55, %c0_56] : memref<1x4x2x128xf32, #tpu.memory_space<vmem>>, vector<1x1x2x128xf32>
    %46 = vector.shape_cast %45 : vector<1x1x2x128xf32> to vector<2x128xf32>
    %47 = vector.shape_cast %44 : vector<2x128xf32> to vector<1x1x2x128xf32>
    tpu.vector_store %arg5[%c0_53, %c0_54, %c0_55, %c0_56], %47 {strides = array<i32>} : memref<1x4x2x128xf32, #tpu.memory_space<vmem>>, vector<1x1x2x128xf32>,
    %48 = vector.broadcast %1 : f32 to vector<2x128xf32>
    %49 = arith.mulf %21, %48 : vector<2x128xf32>
    %50 = vector.broadcast %5 : f32 to vector<2x128xf32>
    %51 = arith.mulf %23, %50 : vector<2x128xf32>
    %52 = arith.addf %49, %51 : vector<2x128xf32>
    %53 = vector.broadcast %9 : f32 to vector<2x128xf32>
    %54 = arith.mulf %25, %53 : vector<2x128xf32>
    %55 = arith.addf %52, %54 : vector<2x128xf32>
    %56 = vector.broadcast %13 : f32 to vector<2x128xf32>
    %57 = arith.mulf %27, %56 : vector<2x128xf32>
    %58 = arith.addf %55, %57 : vector<2x128xf32>
    %59 = vector.broadcast %17 : f32 to vector<2x128xf32>
    %60 = arith.addf %58, %59 : vector<2x128xf32>
    %cst_57 = arith.constant 0.000000e+00 : f32
    %61 = vector.broadcast %cst_57 : f32 to vector<2x128xf32>
    %62 = arith.maximumf %60, %61 : vector<2x128xf32>
    %cst_58 = arith.constant 5.000000e-01 : f32
    %63 = vector.broadcast %cst_58 : f32 to vector<2x128xf32>
    %64 = arith.minimumf %62, %63 : vector<2x128xf32>
    %c0_59 = arith.constant 0 : index
    %c1_60 = arith.constant 1 : index
    %c0_61 = arith.constant 0 : index
    %c0_62 = arith.constant 0 : index
    %65 = vector.load %arg5[%c0_59, %c1_60, %c0_61, %c0_62] : memref<1x4x2x128xf32, #tpu.memory_space<vmem>>, vector<1x1x2x128xf32>
    %66 = vector.shape_cast %65 : vector<1x1x2x128xf32> to vector<2x128xf32>
    %67 = vector.shape_cast %64 : vector<2x128xf32> to vector<1x1x2x128xf32>
    tpu.vector_store %arg5[%c0_59, %c1_60, %c0_61, %c0_62], %67 {strides = array<i32>} : memref<1x4x2x128xf32, #tpu.memory_space<vmem>>, vector<1x1x2x128xf32>,
    %68 = vector.broadcast %2 : f32 to vector<2x128xf32>
    %69 = arith.mulf %21, %68 : vector<2x128xf32>
    %70 = vector.broadcast %6 : f32 to vector<2x128xf32>
    %71 = arith.mulf %23, %70 : vector<2x128xf32>
    %72 = arith.addf %69, %71 : vector<2x128xf32>
    %73 = vector.broadcast %10 : f32 to vector<2x128xf32>
    %74 = arith.mulf %25, %73 : vector<2x128xf32>
    %75 = arith.addf %72, %74 : vector<2x128xf32>
    %76 = vector.broadcast %14 : f32 to vector<2x128xf32>
    %77 = arith.mulf %27, %76 : vector<2x128xf32>
    %78 = arith.addf %75, %77 : vector<2x128xf32>
    %79 = vector.broadcast %18 : f32 to vector<2x128xf32>
    %80 = arith.addf %78, %79 : vector<2x128xf32>
    %cst_63 = arith.constant 0.000000e+00 : f32
    %81 = vector.broadcast %cst_63 : f32 to vector<2x128xf32>
    %82 = arith.maximumf %80, %81 : vector<2x128xf32>
    %cst_64 = arith.constant 5.000000e-01 : f32
    %83 = vector.broadcast %cst_64 : f32 to vector<2x128xf32>
    %84 = arith.minimumf %82, %83 : vector<2x128xf32>
    %c0_65 = arith.constant 0 : index
    %c2_66 = arith.constant 2 : index
    %c0_67 = arith.constant 0 : index
    %c0_68 = arith.constant 0 : index
    %85 = vector.load %arg5[%c0_65, %c2_66, %c0_67, %c0_68] : memref<1x4x2x128xf32, #tpu.memory_space<vmem>>, vector<1x1x2x128xf32>
    %86 = vector.shape_cast %85 : vector<1x1x2x128xf32> to vector<2x128xf32>
    %87 = vector.shape_cast %84 : vector<2x128xf32> to vector<1x1x2x128xf32>
    tpu.vector_store %arg5[%c0_65, %c2_66, %c0_67, %c0_68], %87 {strides = array<i32>} : memref<1x4x2x128xf32, #tpu.memory_space<vmem>>, vector<1x1x2x128xf32>,
    %88 = vector.broadcast %3 : f32 to vector<2x128xf32>
    %89 = arith.mulf %21, %88 : vector<2x128xf32>
    %90 = vector.broadcast %7 : f32 to vector<2x128xf32>
    %91 = arith.mulf %23, %90 : vector<2x128xf32>
    %92 = arith.addf %89, %91 : vector<2x128xf32>
    %93 = vector.broadcast %11 : f32 to vector<2x128xf32>
    %94 = arith.mulf %25, %93 : vector<2x128xf32>
    %95 = arith.addf %92, %94 : vector<2x128xf32>
    %96 = vector.broadcast %15 : f32 to vector<2x128xf32>
    %97 = arith.mulf %27, %96 : vector<2x128xf32>
    %98 = arith.addf %95, %97 : vector<2x128xf32>
    %99 = vector.broadcast %19 : f32 to vector<2x128xf32>
    %100 = arith.addf %98, %99 : vector<2x128xf32>
    %cst_69 = arith.constant 0.000000e+00 : f32
    %101 = vector.broadcast %cst_69 : f32 to vector<2x128xf32>
    %102 = arith.maximumf %100, %101 : vector<2x128xf32>
    %cst_70 = arith.constant 5.000000e-01 : f32
    %103 = vector.broadcast %cst_70 : f32 to vector<2x128xf32>
    %104 = arith.minimumf %102, %103 : vector<2x128xf32>
    %c0_71 = arith.constant 0 : index
    %c3_72 = arith.constant 3 : index
    %c0_73 = arith.constant 0 : index
    %c0_74 = arith.constant 0 : index
    %105 = vector.load %arg5[%c0_71, %c3_72, %c0_73, %c0_74] : memref<1x4x2x128xf32, #tpu.memory_space<vmem>>, vector<1x1x2x128xf32>
    %106 = vector.shape_cast %105 : vector<1x1x2x128xf32> to vector<2x128xf32>
    %107 = vector.shape_cast %104 : vector<2x128xf32> to vector<1x1x2x128xf32>
    tpu.vector_store %arg5[%c0_71, %c3_72, %c0_73, %c0_74], %107 {strides = array<i32>} : memref<1x4x2x128xf32, #tpu.memory_space<vmem>>, vector<1x1x2x128xf32>,
    return
  }
  func.func @transform_0(%arg0: i32, %arg1: i32) -> (i32, i32) {
    %c0_i32 = arith.constant 0 : i32
    %c0_i32_0 = arith.constant 0 : i32
    %c0_i32_1 = arith.constant 0 : i32
    return %c0_i32, %c0_i32_0 : i32, i32
  }
  func.func @transform_1(%arg0: i32, %arg1: i32) -> (i32, i32) {
    %c0_i32 = arith.constant 0 : i32
    %c0_i32_0 = arith.constant 0 : i32
    %c0_i32_1 = arith.constant 0 : i32
    return %c0_i32, %c0_i32_0 : i32, i32
  }
  func.func @transform_2(%arg0: i32, %arg1: i32) -> (i32, i32, i32, i32) {
    %c0_i32 = arith.constant 0 : i32
    %c0_i32_0 = arith.constant 0 : i32
    %c0_i32_1 = arith.constant 0 : i32
    return %arg0, %c0_i32, %arg1, %c0_i32_0 : i32, i32, i32, i32
  }
  func.func @transform_3(%arg0: i32, %arg1: i32) -> (i32, i32, i32, i32) {
    %c0_i32 = arith.constant 0 : i32
    %c0_i32_0 = arith.constant 0 : i32
    %c0_i32_1 = arith.constant 0 : i32
    return %arg0, %c0_i32, %arg1, %c0_i32_0 : i32, i32, i32, i32
  }
}

</mosaic_0001>

<bundles_post_ra>
// kernel: tpu_custom_call.1
= control target key start
LH: loop header
LB: loop body
LE: loop exit
PB: predicated region body
PF: predicated region fallthrough
CT: control target
= control target key end

     0   :  { %8 = vsyncpa [#allocation5], 0  ;;  %s1018_s0 = inlined_call_operand.hbm [shape: f32[4,4], index: 0, kind: input, shape index: {}]   ;;  %s1019_s1 = inlined_call_operand.vmem [shape: f32[1,4], index: 1, kind: input, shape index: {}]   ;;  %s1020_s2 = inlined_call_operand.hbm [shape: f32[2,4,2,128], index: 2, kind: input, shape index: {}]   ;;  %s1021_s3 = inlined_call_operand.hbm [shape: f32[2,4,2,128], index: 3, kind: output, shape index: {}]  }
   0x1   :  { %9 = vsyncpa [#allocation6], 0 }
   0x2   :  { %10 = vsyncpa [#allocation3], 0 }
   0x3   :  { %12 = vsyncpa [#allocation3 + $0x1], 0 }
   0x4   :  { %13 = vsyncpa [#allocation4], 0 }
   0x5   :  { %15 = vsyncpa [#allocation4 + $0x1], 0  ;;  %s759_s12 = smov 0   ;;  %s761_s13 = smov 0  }
   0x6   :  { %s763_s14 = smov 0   ;;  %s765_s15 = smov 0  }
   0x7   :  { %s767_s16 = smov 0   ;;  %s769_s17 = smov 0  }
   0x8 LB: > { %s449_s18 = sadd.s32 4294967295, %s729_s17   ;;  %s450_s19 = sadd.s32 4294967294, %s729_s17   ;;  %s729_s17 = sphi %s769_s17, %s21_s17   ;;  %s725_s16 = sphi %s767_s16, %s1044_s16   ;;  %s721_s15 = sphi %s765_s15, %s1043_s15   ;;  %s717_s14 = sphi %s763_s14, %s1042_s14   ;;  %s713_s13 = sphi %s761_s13, %s1041_s13   ;;  %s709_s12 = sphi %s759_s12, %s1040_s12  }
   0x9   : > { %s84_s20 = sadd.s32 1, %s717_s14  ;;  %p91_p0 = scmp.ne.s32.totalorder %s717_s14, %s713_s13 }
   0xa   : > { %p92_p1 = scmp.eq.s32.totalorder %s729_s17, 0  ;;  %p97_p2 = scmp.ne.s32.totalorder %s713_s13, %s709_s12 }
   0xb   : > { %p797_p3 = scmp.eq.s32.totalorder %s449_s18, 0  ;;  %p123_p4 = scmp.eq.s32.totalorder %s449_s18, 1 }
   0xc   : > { %p93_p5 = por %p92_p1, %p91_p0  ;;  %p129_p6 = scmp.eq.s32.totalorder %s450_s19, 1 }
   0xd   : > { %s1027_s21 = scalar_select %p797_p3, 1, 0 }
   0xe   : > { %p803_p7 = por %p797_p3, %p97_p2  ;;  %p807_p8 = por %p123_p4, %p91_p0 }
   0xf   : > { %p811_p9 = por %p129_p6, %p97_p2  ;;  %p451_p10 = scmp.ge.s32.totalorder %s729_s17, 1 }
  0x10   : > { %s1028_s22 = scalar_select %p803_p7, 1, 0 }
  0x11   : > { %s1029_s23 = scalar_select %p807_p8, 1, 0 }
  0x12   : > { %s1030_s24 = scalar_select %p811_p9, 1, 0 }
  0x13   : > { %p136_p11 = scmp.lt.s32.totalorder %s729_s17, 3  ;;  %p523_p1 = scmp.lt.s32.totalorder %s729_s17, 2 }
  0x14   : > { %s158_s28 = sshll.u32 %s1019_s1, 4  ;;  %s169_s4 = sand.u32 1, %s717_s14   ;;  %s159_s28 = int_to_ptr.vmem [resolvable:$true] %s158_s28 }
  0x15   : > { %p818_p13 = pnand %p451_p10, %p136_p11  ;;  %p828_p4 = pnand %p523_p1, %p93_p5 }
  0x16   : > { %s33_s5 = sadd.s32 1, %s725_s16  ;;  %s581_s8 = scalar_lea.hbm %s1018_s0, 64 }
  0x17   : > { %p506_p0 = pneg %p818_p13  ;;  %p582_p5 = scmp.ne.s32.totalorder %s1018_s0, %s581_s8 }
  0x18   : > { %p588_p1 = scmp.lt.u32.totalorder %s581_s8, %s1018_s0 }
  0x19   : > { %p834_p2 = pnand %p506_p0, %p797_p3 }
  0x1b   : > { %p583_p6 = pneg %p834_p2 }
  0x1d   : > { %p584_p10 = pnand %p583_p6, %p582_p5 }
  0x1f   : > { %p585_p11 = pneg %p584_p10 }
  0x21   : > { %p590_p0 = pnand %p588_p1, %p585_p11 }
  0x23   : > { %593 = shalt.err (!%p590_p0)
}
  0x24   : > { %s731_s19 = smov [#allocation2]   ;;  %s594_s6 = scalar_lea.vmem %s159_s28, 16 }
  0x25   : > { %509 = dma.hbm_to_smem (!%p834_p2), %s1018_s0, 64, %s731_s19, [#allocation5]  }
  0x26   : > { %p595_p12 = scmp.ne.s32.totalorder %s159_s28, %s594_s6  ;;  %p602_p7 = scmp.lt.s32.totalorder %s159_s28, %s159_s28 }
  0x27   : > { %p603_p5 = scmp.lt.s32.totalorder %s594_s6, %s594_s6 }
  0x28   : > { %p597_p9 = pnand %p595_p12, %p583_p6 }
  0x29   : > { %p604_p10 = por %p603_p5, %p602_p7 }
  0x2a   : > { %p598_p8 = pneg %p597_p9 }
  0x2c   : > { %p605_p3 = pnand %p604_p10, %p598_p8 }
  0x2e   : > { %608 = shalt.err (!%p605_p3)
}
  0x2f   : > { %s732_s7 = smov [#allocation7]   ;;  %p35_p11 = scmp.ge.s32.totalorder %s33_s5, 2 }
  0x30   : > { %512 = dma.vmem_to_smem (!%p834_p2), %s159_s28, 16, %s732_s7, [#allocation6]  }
  0x31   : > { %s455_s8 = sshll.u32 %s169_s4, 3  ;;  %s492_s9 = sshll.u32 %s725_s16, 7 }
  0x32   : > { %s1046_s5 = smov (%p35_p11, %s33_s5), 0  ;;  %s866_s30 = scalar_lea.hbm %s1020_s2, %s492_s9 }
  0x33   : > { %s79_s18 = ssub.s32 %s725_s16, %s1046_s5  ;;  %s173_s19 = scalar_lea.vmem [#allocation8], %s455_s8 }
  0x34   : > { %s181_s28 = sshll.u32 %s173_s19, 4  ;;  %p82_p3 = scmp.eq.s32.totalorder %s79_s18, 0  ;;  %s870_s28 = int_to_ptr.vmem [resolvable:$true] %s181_s28 }
  0x35   : > { %s879_s27 = scalar_lea.sflag [#allocation3], %s169_s4  ;;  %s609_s6 = scalar_lea.hbm %s866_s30, 128 }
  0x36   : > { %s875_s26 = scalar_select %p82_p3, %s717_s14, %s84_s20  }
  0x37   : > { %p610_p7 = scmp.ne.s32.totalorder %s866_s30, %s609_s6  ;;  %p611_p8 = pneg %p828_p4 }
  0x38   : > { %s614_s9 = scalar_lea.hbm %s1020_s2, 256  ;;  %p615_p2 = scmp.lt.u32.totalorder %s866_s30, %s1020_s2 }
  0x39   : > { %p612_p9 = pnand %p611_p8, %p610_p7  ;;  %p616_p6 = scmp.lt.u32.totalorder %s614_s9, %s609_s6 }
  0x3a   : > { %p618_p0 = scmp.lt.u32.totalorder %s609_s6, %s866_s30 }
  0x3b   : > { %p613_p12 = pneg %p612_p9  ;;  %p617_p1 = por %p616_p6, %p615_p2 }
  0x3d   : > { %p619_p5 = por %p618_p0, %p617_p1 }
  0x3f   : > { %p620_p10 = pnand %p619_p5, %p613_p12 }
  0x41   : > { %623 = shalt.err (!%p620_p10)
}
  0x42   : > { %s624_s20 = scalar_lea.vmem %s870_s28, 128  ;;  %s733_s4 = smov [#allocation8]  }
  0x43   : > { %p625_p11 = scmp.ne.s32.totalorder %s870_s28, %s624_s20  ;;  %s629_s18 = sshll.u32 %s733_s4, 4  ;;  %s630_s18 = int_to_ptr.vmem [resolvable:$false] %s629_s18 }
  0x44   : > { %s631_s19 = scalar_lea.vmem %s630_s18, 256  ;;  %p632_p9 = scmp.lt.s32.totalorder %s870_s28, %s630_s18 }
  0x45   : > { %p627_p3 = pnand %p625_p11, %p611_p8  ;;  %p633_p2 = scmp.lt.s32.totalorder %s631_s19, %s624_s20 }
  0x47   : > { %p628_p7 = pneg %p627_p3  ;;  %p634_p6 = por %p633_p2, %p632_p9 }
  0x49   : > { %p635_p1 = pnand %p634_p6, %p628_p7 }
  0x4b   : > { %638 = shalt.err (!%p635_p1)
}
  0x4c   : > { %s734_s6 = smov 32   ;;  %s735_s7 = smov 2  }
  0x4d   : > { %516 = dma.hbm_to_vmem [thread:$0]  (!%p828_p4), %s866_s30, 128, %s870_s28, %s879_s27, %s734_s6, %s734_s6, %s735_s7  }
  0x4e   : > { %193 = sbr.rel (%p818_p13) target bundleno = 139 (0x8b), region = 32  ;;  %p1034_p8 = scmp.ne.s32.totalorder (!%p818_p13), %s1027_s21, 0 }
  0x55   : > { %692 = dma.done.wait (%p1034_p8), [#allocation5], 64  }
  0x56   : > { %694 = vsyncadd (%p1034_p8), [#allocation5], 4294967232 }
  0x57   : > { %696 = dma.done.wait (%p1034_p8), [#allocation6], 16  }
  0x58   : > { %698 = vsyncadd (%p1034_p8), [#allocation6], 4294967280  ;;  %s918_s8 = sand.u32 1, %s713_s13   ;;  %p1035_p13 = scmp.ne.s32.totalorder %s1028_s22, 0 }
  0x59   : > { %s1026_s25 = sshll.u32 %s918_s8, 3  ;;  %s204_s29 = scalar_lea.sflag [#allocation3], %s918_s8 }
  0x5a   : > { %s207_s30 = scalar_lea.vmem [#allocation8], %s1026_s25 }
  0x5b   : > { %700 = dma.done.wait (%p1035_p13), %s204_s29, 128  }
  0x5c   : > { %702 = vsyncadd (%p1035_p13), %s204_s29, 4294967168 }
  0x5d   : > { %212 = sfence }
  0x5e   : > { %s231_s28 = sld [smem:[#allocation2]]  ;;  %v251_v0 = vld [vmem:[%s207_s30] sm:$0x3]  ;;  %s463_s10 = sld [smem:[#allocation2 + $0x1]]  ;;  %v481_v1 = vld [vmem:[%s207_s30 + $0x2] sm:$0x3] }
  0x5f   : > { %s466_s21 = sld [smem:[#allocation2 + $0x80]]  ;;  %s467_s20 = sld [smem:[#allocation2 + $0x81]]  ;;  %v482_v2 = vld [vmem:[%s207_s30 + $0x4] sm:$0x3]  ;;  %v483_v4 = vld [vmem:[%s207_s30 + $0x6] sm:$0x3] }
  0x60   : > { %s470_s27 = sld [smem:[#allocation2 + $0x100]]  ;;  %s930_s4 = sld [smem:[#allocation2 + $0x101]] }
  0x61   : > { %s474_s9 = sld [smem:[#allocation2 + $0x180]]  ;;  %s475_s18 = sld [smem:[#allocation2 + $0x181]] }
  0x62   : > { %s928_s11 = sld [smem:[#allocation7]]  ;;  %s932_s19 = sld [smem:[#allocation7 + $0x1]] }
  0x63   : > { %s934_s22 = sld [smem:[#allocation2 + $0x2]]  ;;  %s938_s25 = sld [smem:[#allocation2 + $0x3]] }
  0x64   : > { %v258_v3 = vstv %s231_s28  ;;  %s468_s6 = sld [smem:[#allocation2 + $0x82]]  ;;  %v274_v11 = vstv %s463_s10  ;;  %s940_s28 = sld [smem:[#allocation2 + $0x83]] }
  0x65   : > { %v259_v5 = vmul.f32 %v258_v3, %v251_v0  ;;  %v260_v6 = vstv %s466_s21  ;;  %s472_s7 = sld [smem:[#allocation2 + $0x102]]  ;;  %v275_v14 = vmul.f32 %v274_v11, %v251_v0  ;;  %v276_v15 = vstv %s467_s20  ;;  %s942_s30 = sld [smem:[#allocation2 + $0x103]] }
  0x66   : > { %v263_v7 = vstv %s470_s27  ;;  %v261_v8 = vmul.f32 %v481_v1, %v260_v6  ;;  %s936_s29 = sld [smem:[#allocation2 + $0x182]]  ;;  %s944_s21 = sld [smem:[#allocation2 + $0x183]]  ;;  %v277_v16 = vmul.f32 %v481_v1, %v276_v15  ;;  %v279_v17 = vstv %s930_s4 }
  0x67   : > { %v264_v9 = vmul.f32 %v482_v2, %v263_v7  ;;  %v266_v10 = vstv %s474_s9  ;;  %v282_v18 = vstv %s475_s18  ;;  %s947_s27 = sld [smem:[#allocation7 + $0x2]]  ;;  %v280_v21 = vmul.f32 %v482_v2, %v279_v17  ;;  %s953_s9 = sld [smem:[#allocation7 + $0x3]] }
  0x68   : > { %v262_v12 = vadd.f32 %v261_v8, %v259_v5  ;;  %v267_v13 = vmul.f32 %v483_v4, %v266_v10  ;;  %v269_v20 = vstv %s928_s11  ;;  %v283_v22 = vmul.f32 %v483_v4, %v282_v18  ;;  %s493_s20 = sshll.u32 %s721_s15, 7  ;;  %p1037_p12 = scmp.ne.s32.totalorder %s1029_s23, 0 }
  0x69   : > { %v278_v23 = vadd.f32 %v277_v16, %v275_v14  ;;  %v291_v24 = vstv %s934_s22  ;;  %v285_v32 = vstv %s932_s19  ;;  %v308_v34 = vstv %s938_s25  ;;  %s1036_s25 = sshll.u32 %s918_s8, 3  ;;  %s969_s19 = scalar_lea.hbm %s1021_s3, %s493_s20 }
  0x6a   : > { %v265_v19 = vadd.f32 %v264_v9, %v262_v12  ;;  %v293_v25 = vstv %s468_s6  ;;  %v292_v28 = vmul.f32 %v291_v24, %v251_v0  ;;  %v309_v38 = vmul.f32 %v308_v34, %v251_v0  ;;  %s230_s10 = scalar_lea.vmem [#allocation9], %s1036_s25  ;;  %s326_s22 = scalar_lea.sflag [#allocation4], %s918_s8 }
  0x6b   : > { %v296_v26 = vstv %s472_s7  ;;  %v294_v29 = vmul.f32 %v481_v1, %v293_v25  ;;  %v281_v31 = vadd.f32 %v280_v21, %v278_v23  ;;  %v310_v40 = vstv %s940_s28  ;;  %s340_s11 = sshll.u32 %s230_s10, 4  ;;  %s736_s15 = smov [#allocation9]   ;;  %s964_s11 = int_to_ptr.vmem [resolvable:$true] %s340_s11 }
  0x6c   : > { %v268_v27 = vadd.f32 %v267_v13, %v265_v19  ;;  %v297_v30 = vmul.f32 %v482_v2, %v296_v26  ;;  %v299_v33 = vstv %s936_s29  ;;  %v313_v41 = vstv %s942_s30  ;;  %s639_s6 = scalar_lea.vmem %s964_s11, 128  ;;  %s643_s7 = sshll.u32 %s736_s15, 4  ;;  %s644_s7 = int_to_ptr.vmem [resolvable:$false] %s643_s7 }
  0x6d   : > { %v295_v36 = vadd.f32 %v294_v29, %v292_v28  ;;  %v300_v37 = vmul.f32 %v483_v4, %v299_v33  ;;  %v284_v39 = vadd.f32 %v283_v22, %v281_v31  ;;  %v316_v42 = vstv %s944_s21  ;;  %p640_p4 = scmp.ne.s32.totalorder %s964_s11, %s639_s6  ;;  %s645_s29 = scalar_lea.vmem %s644_s7, 256 }
  0x6e   : > { %v270_v35 = vadd.f32 %v269_v20, %v268_v27  ;;  %v311_v45 = vmul.f32 %v481_v1, %v310_v40  ;;  %v314_v46 = vmul.f32 %v482_v2, %v313_v41  ;;  %v302_v48 = vstv %s947_s27  ;;  %p646_p10 = scmp.lt.s32.totalorder %s964_s11, %s644_s7  ;;  %p647_p11 = scmp.lt.s32.totalorder %s645_s29, %s639_s6 }
  0x6f   : > { %v298_v44 = vadd.f32 %v297_v30, %v295_v36  ;;  %v286_v47 = vadd.f32 %v285_v32, %v284_v39  ;;  %v317_v52 = vmul.f32 %v483_v4, %v316_v42  ;;  %v319_v57 = vstv %s953_s9  ;;  %p641_p0 = pnand %p640_p4, %p1037_p12 }
  0x70   : > { %v271_v43 = vmax.f32 %v270_v35, 0.0  ;;  %v312_v51 = vadd.f32 %v311_v45, %v309_v38  ;;  %p648_p3 = por %p647_p11, %p646_p10 }
  0x71   : > { %v301_v50 = vadd.f32 %v300_v37, %v298_v44  ;;  %v287_v53 = vmax.f32 %v286_v47, 0.0  ;;  %p642_p5 = pneg %p641_p0 }
  0x72   : > { %v272_v49 = vmin.f32 %v271_v43, 0.5  ;;  %v315_v55 = vadd.f32 %v314_v46, %v312_v51 }
  0x73   : > { %v303_v54 = vadd.f32 %v302_v48, %v301_v50  ;;  %v288_v56 = vmin.f32 %v287_v53, 0.5  ;;  %p649_p7 = pnand %p648_p3, %p642_p5 }
  0x74   : > { %273 = vst [vmem:[%s230_s10] sm:$0x3] %v272_v49  ;;  %v318_v59 = vadd.f32 %v317_v52, %v315_v55 }
  0x75   : > { %v304_v58 = vmax.f32 %v303_v54, 0.0  ;;  %484 = vst [vmem:[%s230_s10 + $0x2] sm:$0x3] %v288_v56 }
  0x76   : > { %v320_v61 = vadd.f32 %v319_v57, %v318_v59 }
  0x77   : > { %v305_v60 = vmin.f32 %v304_v58, 0.5 }
  0x78   : > { %v321_v62 = vmax.f32 %v320_v61, 0.0 }
  0x79   : > { %485 = vst [vmem:[%s230_s10 + $0x4] sm:$0x3] %v305_v60 }
  0x7a   : > { %v322_v63 = vmin.f32 %v321_v62, 0.5 }
  0x7c   : > { %486 = vst [vmem:[%s230_s10 + $0x6] sm:$0x3] %v322_v63 }
  0x7d   : > { %652 = shalt.err (!%p649_p7)
}
  0x7e   : > { %s653_s28 = scalar_lea.hbm %s969_s19, 128  ;;  %s657_s27 = scalar_lea.hbm %s1021_s3, 256 }
  0x7f   : > { %p654_p9 = scmp.ne.s32.totalorder %s969_s19, %s653_s28  ;;  %p658_p1 = scmp.lt.u32.totalorder %s969_s19, %s1021_s3 }
  0x80   : > { %p659_p8 = scmp.lt.u32.totalorder %s657_s27, %s653_s28  ;;  %p661_p4 = scmp.lt.u32.totalorder %s653_s28, %s969_s19 }
  0x81   : > { %p655_p2 = pnand %p654_p9, %p1037_p12 }
  0x82   : > { %p660_p13 = por %p659_p8, %p658_p1 }
  0x83   : > { %p656_p6 = pneg %p655_p2 }
  0x84   : > { %p662_p0 = por %p661_p4, %p660_p13 }
  0x86   : > { %p663_p5 = pnand %p662_p0, %p656_p6 }
  0x88   : > { %666 = shalt.err (!%p663_p5)
}
  0x89   : > { %s737_s10 = smov 32   ;;  %s738_s20 = smov 2  }
  0x8a   : > { %504 = dma.vmem_to_hbm [thread:$0]  (%p1037_p12), %s964_s11, 128, %s969_s19, %s326_s22, %s737_s10, %s737_s10, %s738_s20  }
  0x8b PF: > { %s355_s4 = sand.u32 1, %s709_s12   ;;  %p1038_p10 = scmp.ne.s32.totalorder %s1030_s24, 0 }
  0x8c   : > { %p1039_p11 = scmp.ge.s32.totalorder %s729_s17, 2  ;;  %s356_s18 = scalar_lea.sflag [#allocation4], %s355_s4 }
  0x8e   : > { %p518_p3 = pnand %p1039_p11, %p1038_p10 }
  0x90   : > { %704 = dma.done.wait (!%p518_p3), %s356_s18, 128  }
  0x91   : > { %706 = vsyncadd (!%p518_p3), %s356_s18, 4294967168  ;;  %s21_s17 = sadd.s32 1, %s729_s17   ;;  %s1040_s12 = smov %s713_s13 }
  0x92   : > { %p18_p7 = scmp.ge.s32.totalorder %s21_s17, 4   ;;  %s1041_s13 = smov %s717_s14 }
  0x93   : > { %s1042_s14 = smov %s875_s26  ;;  %s1043_s15 = smov %s725_s16 }
  0x94   : > { %s1044_s16 = smov %s1046_s5  ;;  %20 = sbr.rel (!%p18_p7) target bundleno = 8 (0x8), region = 93 }
  0x9b   :  { %361 = vsyncpa [#allocation3], 1 }
  0x9c   :  { %363 = vsyncpa [#allocation3 + $0x1], 1 }
  0x9d   :  { %364 = vsyncpa [#allocation4], 1 }
  0x9e   :  { %366 = vsyncpa [#allocation4 + $0x1], 1 }
  0x9f   :  { %367 = vsyncpa [#allocation5], 1 }
  0xa0   :  { %369 = vsyncpa [#allocation5 + $0x1], 1 }
  0xa1   :  { %370 = vsyncpa [#allocation6], 1 }
  0xa2   :  { %372 = vsyncpa [#allocation6 + $0x1], 1 }

</bundles_post_ra>
